<compile_context>
chip_gen: v5e
topology: v5e:2x2
jax: 0.10.0
libtpu: 0.0.40
codegen_flags: <defaults>
</compile_context>

<pallas_src>
import jax
import jax.numpy as jnp
from jax.experimental import pallas as pl
from jax.experimental.pallas import tpu as pltpu


def _linear_double_kernel(xt_ref, w_ref, b_ref, ot_ref):
    # xt_ref: [IN_F, TB] f32 in VMEM  (batch on the lane axis)
    # w_ref : [OUT_F, IN_F] f32 in SMEM (scalar reads)
    # b_ref : [OUT_F]      f32 in SMEM (scalar reads)
    # ot_ref: [OUT_F, TB]  in VMEM    (lane-dense output tile)
    xt = xt_ref[...]
    in_f, tb = xt.shape
    out_f = ot_ref.shape[0]
    for j in range(out_f):                       # static unroll: 5 output rows
        acc = jnp.full((1, tb), b_ref[j], dtype=jnp.float32)
        for k in range(in_f):                    # static unroll: 4 VPU FMAs
            acc = acc + (w_ref[j, k] * 2.0) * xt[k:k + 1, :]
        ot_ref[j:j + 1, :] = acc.astype(ot_ref.dtype)


def my_module_forward(x, weight, bias, *, tb=8192):
    """x: [B, 4] f32, weight: [5, 4] f32 (PyTorch layout), bias: [5] f32."""
    B, in_f = x.shape
    out_f = weight.shape[0]

    # Glue layout work in plain JAX: batch onto the lane (last) axis.
    xt = x.T                                     # [in_f, B]

    if B <= tb:
        # Single block over the full array (no 128-divisibility requirement).
        TB = B
        Bp = B
        grid = (1,)
    else:
        # Tile the batch; TB is a multiple of 128 so tiles are lane-aligned.
        TB = tb
        n_blocks = pl.cdiv(B, TB)
        Bp = n_blocks * TB
        if Bp != B:
            xt = jnp.pad(xt, ((0, 0), (0, Bp - B)))
        grid = (n_blocks,)

    out_t = pl.pallas_call(
        _linear_double_kernel,
        out_shape=jax.ShapeDtypeStruct((out_f, Bp), x.dtype),
        grid=grid,
        in_specs=[
            pl.BlockSpec((in_f, TB), lambda i: (0, i)),
            pl.BlockSpec(memory_space=pltpu.MemorySpace.SMEM),   # weight scalars
            pl.BlockSpec(memory_space=pltpu.MemorySpace.SMEM),   # bias scalars
        ],
        out_specs=pl.BlockSpec((out_f, TB), lambda i: (0, i)),
        compiler_params=pltpu.CompilerParams(
            dimension_semantics=("parallel",),          # megacore sharding on v7x
            vmem_limit_bytes=32 * 1024 * 1024,          # explicit, fits all gens
        ),
    )(xt, weight, bias)

    return out_t[:, :B].T                        # back to [B, out_f]


if __name__ == "__main__":
    key = jax.random.PRNGKey(0)
    kx, kw, kb = jax.random.split(key, 3)

    B, IN_F, OUT_F = 8, 4, 5
    x = jax.random.normal(kx, (B, IN_F), dtype=jnp.float32)
    # Deterministic "Linear(4, 5)" parameters (PyTorch weight layout [out, in]).
    weight = jax.random.normal(kw, (OUT_F, IN_F), dtype=jnp.float32) * 0.5
    bias = jax.random.normal(kb, (OUT_F,), dtype=jnp.float32) * 0.1

    out = jax.block_until_ready(my_module_forward(x, weight, bias))
    ref = (x + x) @ weight.T + bias
    assert out.shape == (B, OUT_F)
    assert jnp.allclose(out, ref, atol=1e-5, rtol=1e-5)

    # Also exercise the tiled / padded multi-block (large-batch) path.
    B2 = 2 * 8192 + 100
    x_big = jax.random.normal(kx, (B2, IN_F), dtype=jnp.float32)
    out_big = jax.block_until_ready(my_module_forward(x_big, weight, bias, tb=8192))
    ref_big = (x_big + x_big) @ weight.T + bias
    assert out_big.shape == (B2, OUT_F)
    assert jnp.allclose(out_big, ref_big, atol=1e-5, rtol=1e-5)

    print("KERNEL_OK")
</pallas_src>

<mosaic_0001>
module attributes {stable_mosaic.version = 11 : i64} {
  func.func @_linear_double_kernel(%arg0: i32, %arg1: memref<4x8xf32, #tpu.memory_space<vmem>>, %arg2: memref<5x4xf32, #tpu.memory_space<smem>>, %arg3: memref<5xf32, #tpu.memory_space<smem>>, %arg4: memref<5x8xf32, #tpu.memory_space<vmem>>) attributes {dimension_semantics = [#tpu.dimension_semantics<parallel>], iteration_bounds = array<i64: 1>, scalar_prefetch = 0 : i64, scratch_operands = 0 : i64, tpu.core_type = #tpu.core_type<tc>, window_params = [{transform_indices = @transform_0, window_bounds = array<i64: 4, 8>}, {transform_indices = @transform_1, window_bounds = array<i64: 5, 4>}, {transform_indices = @transform_2, window_bounds = array<i64: 5>}, {transform_indices = @transform_3, window_bounds = array<i64: 5, 8>}]} {
    %c0 = arith.constant 0 : index
    %c0_0 = arith.constant 0 : index
    %0 = vector.load %arg1[%c0, %c0_0] : memref<4x8xf32, #tpu.memory_space<vmem>>, vector<4x8xf32>
    %c0_1 = arith.constant 0 : index
    %1 = memref.load %arg3[%c0_1] : memref<5xf32, #tpu.memory_space<smem>>
    %2 = vector.broadcast %1 : f32 to vector<1x8xf32>
    %c0_2 = arith.constant 0 : index
    %c0_3 = arith.constant 0 : index
    %3 = memref.load %arg2[%c0_2, %c0_3] : memref<5x4xf32, #tpu.memory_space<smem>>
    %cst = arith.constant 2.000000e+00 : f32
    %4 = arith.mulf %3, %cst : f32
    %5 = vector.extract_strided_slice %0 {offsets = [0, 0], sizes = [1, 8], strides = [1, 1]} : vector<4x8xf32> to vector<1x8xf32>
    %6 = vector.broadcast %4 : f32 to vector<1x8xf32>
    %7 = arith.mulf %6, %5 : vector<1x8xf32>
    %8 = arith.addf %2, %7 : vector<1x8xf32>
    %c0_4 = arith.constant 0 : index
    %c1 = arith.constant 1 : index
    %9 = memref.load %arg2[%c0_4, %c1] : memref<5x4xf32, #tpu.memory_space<smem>>
    %cst_5 = arith.constant 2.000000e+00 : f32
    %10 = arith.mulf %9, %cst_5 : f32
    %11 = vector.extract_strided_slice %0 {offsets = [1, 0], sizes = [1, 8], strides = [1, 1]} : vector<4x8xf32> to vector<1x8xf32>
    %12 = vector.broadcast %10 : f32 to vector<1x8xf32>
    %13 = arith.mulf %12, %11 : vector<1x8xf32>
    %14 = arith.addf %8, %13 : vector<1x8xf32>
    %c0_6 = arith.constant 0 : index
    %c2 = arith.constant 2 : index
    %15 = memref.load %arg2[%c0_6, %c2] : memref<5x4xf32, #tpu.memory_space<smem>>
    %cst_7 = arith.constant 2.000000e+00 : f32
    %16 = arith.mulf %15, %cst_7 : f32
    %17 = vector.extract_strided_slice %0 {offsets = [2, 0], sizes = [1, 8], strides = [1, 1]} : vector<4x8xf32> to vector<1x8xf32>
    %18 = vector.broadcast %16 : f32 to vector<1x8xf32>
    %19 = arith.mulf %18, %17 : vector<1x8xf32>
    %20 = arith.addf %14, %19 : vector<1x8xf32>
    %c0_8 = arith.constant 0 : index
    %c3 = arith.constant 3 : index
    %21 = memref.load %arg2[%c0_8, %c3] : memref<5x4xf32, #tpu.memory_space<smem>>
    %cst_9 = arith.constant 2.000000e+00 : f32
    %22 = arith.mulf %21, %cst_9 : f32
    %23 = vector.extract_strided_slice %0 {offsets = [3, 0], sizes = [1, 8], strides = [1, 1]} : vector<4x8xf32> to vector<1x8xf32>
    %24 = vector.broadcast %22 : f32 to vector<1x8xf32>
    %25 = arith.mulf %24, %23 : vector<1x8xf32>
    %26 = arith.addf %20, %25 : vector<1x8xf32>
    %c0_10 = arith.constant 0 : index
    %c0_11 = arith.constant 0 : index
    %27 = vector.load %arg4[%c0_10, %c0_11] : memref<5x8xf32, #tpu.memory_space<vmem>>, vector<1x8xf32>
    tpu.vector_store %arg4[%c0_10, %c0_11], %26 {strides = array<i32>} : memref<5x8xf32, #tpu.memory_space<vmem>>, vector<1x8xf32>,
    %c1_12 = arith.constant 1 : index
    %28 = memref.load %arg3[%c1_12] : memref<5xf32, #tpu.memory_space<smem>>
    %29 = vector.broadcast %28 : f32 to vector<1x8xf32>
    %c1_13 = arith.constant 1 : index
    %c0_14 = arith.constant 0 : index
    %30 = memref.load %arg2[%c1_13, %c0_14] : memref<5x4xf32, #tpu.memory_space<smem>>
    %cst_15 = arith.constant 2.000000e+00 : f32
    %31 = arith.mulf %30, %cst_15 : f32
    %32 = vector.extract_strided_slice %0 {offsets = [0, 0], sizes = [1, 8], strides = [1, 1]} : vector<4x8xf32> to vector<1x8xf32>
    %33 = vector.broadcast %31 : f32 to vector<1x8xf32>
    %34 = arith.mulf %33, %32 : vector<1x8xf32>
    %35 = arith.addf %29, %34 : vector<1x8xf32>
    %c1_16 = arith.constant 1 : index
    %c1_17 = arith.constant 1 : index
    %36 = memref.load %arg2[%c1_16, %c1_17] : memref<5x4xf32, #tpu.memory_space<smem>>
    %cst_18 = arith.constant 2.000000e+00 : f32
    %37 = arith.mulf %36, %cst_18 : f32
    %38 = vector.extract_strided_slice %0 {offsets = [1, 0], sizes = [1, 8], strides = [1, 1]} : vector<4x8xf32> to vector<1x8xf32>
    %39 = vector.broadcast %37 : f32 to vector<1x8xf32>
    %40 = arith.mulf %39, %38 : vector<1x8xf32>
    %41 = arith.addf %35, %40 : vector<1x8xf32>
    %c1_19 = arith.constant 1 : index
    %c2_20 = arith.constant 2 : index
    %42 = memref.load %arg2[%c1_19, %c2_20] : memref<5x4xf32, #tpu.memory_space<smem>>
    %cst_21 = arith.constant 2.000000e+00 : f32
    %43 = arith.mulf %42, %cst_21 : f32
    %44 = vector.extract_strided_slice %0 {offsets = [2, 0], sizes = [1, 8], strides = [1, 1]} : vector<4x8xf32> to vector<1x8xf32>
    %45 = vector.broadcast %43 : f32 to vector<1x8xf32>
    %46 = arith.mulf %45, %44 : vector<1x8xf32>
    %47 = arith.addf %41, %46 : vector<1x8xf32>
    %c1_22 = arith.constant 1 : index
    %c3_23 = arith.constant 3 : index
    %48 = memref.load %arg2[%c1_22, %c3_23] : memref<5x4xf32, #tpu.memory_space<smem>>
    %cst_24 = arith.constant 2.000000e+00 : f32
    %49 = arith.mulf %48, %cst_24 : f32
    %50 = vector.extract_strided_slice %0 {offsets = [3, 0], sizes = [1, 8], strides = [1, 1]} : vector<4x8xf32> to vector<1x8xf32>
    %51 = vector.broadcast %49 : f32 to vector<1x8xf32>
    %52 = arith.mulf %51, %50 : vector<1x8xf32>
    %53 = arith.addf %47, %52 : vector<1x8xf32>
    %c1_25 = arith.constant 1 : index
    %c0_26 = arith.constant 0 : index
    %54 = vector.load %arg4[%c1_25, %c0_26] : memref<5x8xf32, #tpu.memory_space<vmem>>, vector<1x8xf32>
    tpu.vector_store %arg4[%c1_25, %c0_26], %53 {strides = array<i32>} : memref<5x8xf32, #tpu.memory_space<vmem>>, vector<1x8xf32>,
    %c2_27 = arith.constant 2 : index
    %55 = memref.load %arg3[%c2_27] : memref<5xf32, #tpu.memory_space<smem>>
    %56 = vector.broadcast %55 : f32 to vector<1x8xf32>
    %c2_28 = arith.constant 2 : index
    %c0_29 = arith.constant 0 : index
    %57 = memref.load %arg2[%c2_28, %c0_29] : memref<5x4xf32, #tpu.memory_space<smem>>
    %cst_30 = arith.constant 2.000000e+00 : f32
    %58 = arith.mulf %57, %cst_30 : f32
    %59 = vector.extract_strided_slice %0 {offsets = [0, 0], sizes = [1, 8], strides = [1, 1]} : vector<4x8xf32> to vector<1x8xf32>
    %60 = vector.broadcast %58 : f32 to vector<1x8xf32>
    %61 = arith.mulf %60, %59 : vector<1x8xf32>
    %62 = arith.addf %56, %61 : vector<1x8xf32>
    %c2_31 = arith.constant 2 : index
    %c1_32 = arith.constant 1 : index
    %63 = memref.load %arg2[%c2_31, %c1_32] : memref<5x4xf32, #tpu.memory_space<smem>>
    %cst_33 = arith.constant 2.000000e+00 : f32
    %64 = arith.mulf %63, %cst_33 : f32
    %65 = vector.extract_strided_slice %0 {offsets = [1, 0], sizes = [1, 8], strides = [1, 1]} : vector<4x8xf32> to vector<1x8xf32>
    %66 = vector.broadcast %64 : f32 to vector<1x8xf32>
    %67 = arith.mulf %66, %65 : vector<1x8xf32>
    %68 = arith.addf %62, %67 : vector<1x8xf32>
    %c2_34 = arith.constant 2 : index
    %c2_35 = arith.constant 2 : index
    %69 = memref.load %arg2[%c2_34, %c2_35] : memref<5x4xf32, #tpu.memory_space<smem>>
    %cst_36 = arith.constant 2.000000e+00 : f32
    %70 = arith.mulf %69, %cst_36 : f32
    %71 = vector.extract_strided_slice %0 {offsets = [2, 0], sizes = [1, 8], strides = [1, 1]} : vector<4x8xf32> to vector<1x8xf32>
    %72 = vector.broadcast %70 : f32 to vector<1x8xf32>
    %73 = arith.mulf %72, %71 : vector<1x8xf32>
    %74 = arith.addf %68, %73 : vector<1x8xf32>
    %c2_37 = arith.constant 2 : index
    %c3_38 = arith.constant 3 : index
    %75 = memref.load %arg2[%c2_37, %c3_38] : memref<5x4xf32, #tpu.memory_space<smem>>
    %cst_39 = arith.constant 2.000000e+00 : f32
    %76 = arith.mulf %75, %cst_39 : f32
    %77 = vector.extract_strided_slice %0 {offsets = [3, 0], sizes = [1, 8], strides = [1, 1]} : vector<4x8xf32> to vector<1x8xf32>
    %78 = vector.broadcast %76 : f32 to vector<1x8xf32>
    %79 = arith.mulf %78, %77 : vector<1x8xf32>
    %80 = arith.addf %74, %79 : vector<1x8xf32>
    %c2_40 = arith.constant 2 : index
    %c0_41 = arith.constant 0 : index
    %81 = vector.load %arg4[%c2_40, %c0_41] : memref<5x8xf32, #tpu.memory_space<vmem>>, vector<1x8xf32>
    tpu.vector_store %arg4[%c2_40, %c0_41], %80 {strides = array<i32>} : memref<5x8xf32, #tpu.memory_space<vmem>>, vector<1x8xf32>,
    %c3_42 = arith.constant 3 : index
    %82 = memref.load %arg3[%c3_42] : memref<5xf32, #tpu.memory_space<smem>>
    %83 = vector.broadcast %82 : f32 to vector<1x8xf32>
    %c3_43 = arith.constant 3 : index
    %c0_44 = arith.constant 0 : index
    %84 = memref.load %arg2[%c3_43, %c0_44] : memref<5x4xf32, #tpu.memory_space<smem>>
    %cst_45 = arith.constant 2.000000e+00 : f32
    %85 = arith.mulf %84, %cst_45 : f32
    %86 = vector.extract_strided_slice %0 {offsets = [0, 0], sizes = [1, 8], strides = [1, 1]} : vector<4x8xf32> to vector<1x8xf32>
    %87 = vector.broadcast %85 : f32 to vector<1x8xf32>
    %88 = arith.mulf %87, %86 : vector<1x8xf32>
    %89 = arith.addf %83, %88 : vector<1x8xf32>
    %c3_46 = arith.constant 3 : index
    %c1_47 = arith.constant 1 : index
    %90 = memref.load %arg2[%c3_46, %c1_47] : memref<5x4xf32, #tpu.memory_space<smem>>
    %cst_48 = arith.constant 2.000000e+00 : f32
    %91 = arith.mulf %90, %cst_48 : f32
    %92 = vector.extract_strided_slice %0 {offsets = [1, 0], sizes = [1, 8], strides = [1, 1]} : vector<4x8xf32> to vector<1x8xf32>
    %93 = vector.broadcast %91 : f32 to vector<1x8xf32>
    %94 = arith.mulf %93, %92 : vector<1x8xf32>
    %95 = arith.addf %89, %94 : vector<1x8xf32>
    %c3_49 = arith.constant 3 : index
    %c2_50 = arith.constant 2 : index
    %96 = memref.load %arg2[%c3_49, %c2_50] : memref<5x4xf32, #tpu.memory_space<smem>>
    %cst_51 = arith.constant 2.000000e+00 : f32
    %97 = arith.mulf %96, %cst_51 : f32
    %98 = vector.extract_strided_slice %0 {offsets = [2, 0], sizes = [1, 8], strides = [1, 1]} : vector<4x8xf32> to vector<1x8xf32>
    %99 = vector.broadcast %97 : f32 to vector<1x8xf32>
    %100 = arith.mulf %99, %98 : vector<1x8xf32>
    %101 = arith.addf %95, %100 : vector<1x8xf32>
    %c3_52 = arith.constant 3 : index
    %c3_53 = arith.constant 3 : index
    %102 = memref.load %arg2[%c3_52, %c3_53] : memref<5x4xf32, #tpu.memory_space<smem>>
    %cst_54 = arith.constant 2.000000e+00 : f32
    %103 = arith.mulf %102, %cst_54 : f32
    %104 = vector.extract_strided_slice %0 {offsets = [3, 0], sizes = [1, 8], strides = [1, 1]} : vector<4x8xf32> to vector<1x8xf32>
    %105 = vector.broadcast %103 : f32 to vector<1x8xf32>
    %106 = arith.mulf %105, %104 : vector<1x8xf32>
    %107 = arith.addf %101, %106 : vector<1x8xf32>
    %c3_55 = arith.constant 3 : index
    %c0_56 = arith.constant 0 : index
    %108 = vector.load %arg4[%c3_55, %c0_56] : memref<5x8xf32, #tpu.memory_space<vmem>>, vector<1x8xf32>
    tpu.vector_store %arg4[%c3_55, %c0_56], %107 {strides = array<i32>} : memref<5x8xf32, #tpu.memory_space<vmem>>, vector<1x8xf32>,
    %c4 = arith.constant 4 : index
    %109 = memref.load %arg3[%c4] : memref<5xf32, #tpu.memory_space<smem>>
    %110 = vector.broadcast %109 : f32 to vector<1x8xf32>
    %c4_57 = arith.constant 4 : index
    %c0_58 = arith.constant 0 : index
    %111 = memref.load %arg2[%c4_57, %c0_58] : memref<5x4xf32, #tpu.memory_space<smem>>
    %cst_59 = arith.constant 2.000000e+00 : f32
    %112 = arith.mulf %111, %cst_59 : f32
    %113 = vector.extract_strided_slice %0 {offsets = [0, 0], sizes = [1, 8], strides = [1, 1]} : vector<4x8xf32> to vector<1x8xf32>
    %114 = vector.broadcast %112 : f32 to vector<1x8xf32>
    %115 = arith.mulf %114, %113 : vector<1x8xf32>
    %116 = arith.addf %110, %115 : vector<1x8xf32>
    %c4_60 = arith.constant 4 : index
    %c1_61 = arith.constant 1 : index
    %117 = memref.load %arg2[%c4_60, %c1_61] : memref<5x4xf32, #tpu.memory_space<smem>>
    %cst_62 = arith.constant 2.000000e+00 : f32
    %118 = arith.mulf %117, %cst_62 : f32
    %119 = vector.extract_strided_slice %0 {offsets = [1, 0], sizes = [1, 8], strides = [1, 1]} : vector<4x8xf32> to vector<1x8xf32>
    %120 = vector.broadcast %118 : f32 to vector<1x8xf32>
    %121 = arith.mulf %120, %119 : vector<1x8xf32>
    %122 = arith.addf %116, %121 : vector<1x8xf32>
    %c4_63 = arith.constant 4 : index
    %c2_64 = arith.constant 2 : index
    %123 = memref.load %arg2[%c4_63, %c2_64] : memref<5x4xf32, #tpu.memory_space<smem>>
    %cst_65 = arith.constant 2.000000e+00 : f32
    %124 = arith.mulf %123, %cst_65 : f32
    %125 = vector.extract_strided_slice %0 {offsets = [2, 0], sizes = [1, 8], strides = [1, 1]} : vector<4x8xf32> to vector<1x8xf32>
    %126 = vector.broadcast %124 : f32 to vector<1x8xf32>
    %127 = arith.mulf %126, %125 : vector<1x8xf32>
    %128 = arith.addf %122, %127 : vector<1x8xf32>
    %c4_66 = arith.constant 4 : index
    %c3_67 = arith.constant 3 : index
    %129 = memref.load %arg2[%c4_66, %c3_67] : memref<5x4xf32, #tpu.memory_space<smem>>
    %cst_68 = arith.constant 2.000000e+00 : f32
    %130 = arith.mulf %129, %cst_68 : f32
    %131 = vector.extract_strided_slice %0 {offsets = [3, 0], sizes = [1, 8], strides = [1, 1]} : vector<4x8xf32> to vector<1x8xf32>
    %132 = vector.broadcast %130 : f32 to vector<1x8xf32>
    %133 = arith.mulf %132, %131 : vector<1x8xf32>
    %134 = arith.addf %128, %133 : vector<1x8xf32>
    %c4_69 = arith.constant 4 : index
    %c0_70 = arith.constant 0 : index
    %135 = vector.load %arg4[%c4_69, %c0_70] : memref<5x8xf32, #tpu.memory_space<vmem>>, vector<1x8xf32>
    tpu.vector_store %arg4[%c4_69, %c0_70], %134 {strides = array<i32>} : memref<5x8xf32, #tpu.memory_space<vmem>>, vector<1x8xf32>,
    return
  }
  func.func @transform_0(%arg0: i32) -> (i32, i32) {
    %c0_i32 = arith.constant 0 : i32
    %c0_i32_0 = arith.constant 0 : i32
    return %c0_i32, %arg0 : i32, i32
  }
  func.func @transform_1(%arg0: i32) -> (i32, i32) {
    %c0_i32 = arith.constant 0 : i32
    %c0_i32_0 = arith.constant 0 : i32
    %c0_i32_1 = arith.constant 0 : i32
    return %c0_i32, %c0_i32_0 : i32, i32
  }
  func.func @transform_2(%arg0: i32) -> i32 {
    %c0_i32 = arith.constant 0 : i32
    %c0_i32_0 = arith.constant 0 : i32
    return %c0_i32 : i32
  }
  func.func @transform_3(%arg0: i32) -> (i32, i32) {
    %c0_i32 = arith.constant 0 : i32
    %c0_i32_0 = arith.constant 0 : i32
    return %c0_i32, %arg0 : i32, i32
  }
}

</mosaic_0001>

<bundles_post_ra>
// kernel: tpu_custom_call.1
= control target key start
LH: loop header
LB: loop body
LE: loop exit
PB: predicated region body
PF: predicated region fallthrough
CT: control target
= control target key end

     0   :  { %8 = vsyncpa [#allocation4], 0  ;;  %s419_s0 = inlined_call_operand.vmem [shape: f32[4,8], index: 0, kind: input, shape index: {}]   ;;  %s420_s1 = inlined_call_operand.vmem [shape: f32[5,4], index: 1, kind: input, shape index: {}]   ;;  %s421_s2 = inlined_call_operand.vmem [shape: f32[5], index: 2, kind: input, shape index: {}]   ;;  %s422_s3 = inlined_call_operand.hbm [shape: f32[5,8], index: 3, kind: output, shape index: {}]  }
   0x1   :  { %9 = vsyncpa [#allocation6], 0 }
   0x2   :  { %10 = vsyncpa [#allocation3], 0  ;;  %s18_s14 = sshll.u32 %s420_s1, 4  ;;  %s27_s17 = sshll.u32 %s421_s2, 4  ;;  %s19_s14 = int_to_ptr.vmem [resolvable:$true] %s18_s14  ;;  %s28_s17 = int_to_ptr.vmem [resolvable:$true] %s27_s17 }
   0x3   :  { %s300_s18 = smov [#allocation2]   ;;  %s301_s19 = smov [#allocation5]  }
   0x4   :  { %21 = dma.vmem_to_smem %s19_s14, 128, %s300_s18, [#allocation4]  }
   0x5   :  { %30 = dma.vmem_to_smem %s28_s17, 16, %s301_s19, [#allocation6]  }
   0x6   :  { %294 = dma.done.wait [#allocation4], 128  }
   0x7   :  { %295 = vsyncadd [#allocation4], 4294967168 }
   0x8   :  { %296 = dma.done.wait [#allocation6], 16  }
   0x9   :  { %297 = vsyncadd [#allocation6], 4294967280 }
   0xa   :  { %39 = sfence }
   0xb   :  { %s41_s20 = sld [smem:[#allocation5]]  ;;  %v334_v0 = vld [vmem:[%s419_s0] sm:$0xf]  ;;  %vm72_vm0 = vcmask 57344  }
   0xc   :  { %s43_s21 = sld [smem:[#allocation2]] }
   0xd   :  { %s220_s22 = sld [smem:[#allocation2 + $0x1]] }
   0xe   :  { %s221_s23 = sld [smem:[#allocation2 + $0x2]] }
   0xf   :  { %s222_s1 = sld [smem:[#allocation2 + $0x3]] }
  0x10   :  { %s329_s24 = sld [smem:[#allocation5 + $0x1]] }
  0x11   :  { %s224_s25 = sld [smem:[#allocation2 + $0x80]]  ;;  %v42_v1 = vstv %s41_s20 }
  0x12   :  { %s44_s27 = smul.f32 2.0, %s43_s21  ;;  %s336_s28 = sld [smem:[#allocation2 + $0x81]] }
  0x13   :  { %s49_s29 = smul.f32 2.0, %s220_s22  ;;  %s338_s30 = sld [smem:[#allocation2 + $0x82]] }
  0x14   :  { %v45_v2 = vstv %s44_s27  ;;  %s57_s4 = smul.f32 2.0, %s221_s23  ;;  %s340_s5 = sld [smem:[#allocation2 + $0x83]] }
  0x15   :  { %v46_v3 = vmul.f32 %v45_v2, %v334_v0  ;;  %v50_v4 = vstv %s49_s29  ;;  %s65_s6 = smul.f32 2.0, %s222_s1  ;;  %s343_s7 = sld [smem:[#allocation5 + $0x2]] }
  0x16   :  { %v51_v5 = vmul.f32 %v50_v4, %v334_v0  ;;  %v58_v6 = vstv %s57_s4  ;;  %s346_s0 = sld [smem:[#allocation2 + $0x100]]  ;;  %v75_v13 = vstv %s329_s24 }
  0x17   :  { %v47_v7 = vadd.f32 %v46_v3, %v42_v1  ;;  %v59_v8 = vmul.f32 %v58_v6, %v334_v0  ;;  %v66_v9 = vstv %s65_s6  ;;  %s77_s8 = smul.f32 2.0, %s224_s25  ;;  %s349_s9 = sld [smem:[#allocation2 + $0x101]] }
  0x18   :  { %v53_v10 = vrot.slane %v51_v5, 1  ;;  %v67_v11 = vmul.f32 %v66_v9, %v334_v0  ;;  %s82_s10 = smul.f32 2.0, %s336_s28  ;;  %s353_s11 = sld [smem:[#allocation2 + $0x102]] }
  0x19   :  { %v61_v12 = vrot.slane %v59_v8, 2  ;;  %v78_v14 = vstv %s77_s8  ;;  %s90_s12 = smul.f32 2.0, %s338_s30  ;;  %s357_s13 = sld [smem:[#allocation2 + $0x103]] }
  0x1a   :  { %v55_v15 = vadd.f32 %v53_v10, %v47_v7  ;;  %v69_v16 = vrot.slane %v67_v11, 3  ;;  %v79_v17 = vmul.f32 %v78_v14, %v334_v0  ;;  %v83_v18 = vstv %s82_s10  ;;  %s98_s14 = smul.f32 2.0, %s340_s5  ;;  %s361_s15 = sld [smem:[#allocation5 + $0x3]] }
  0x1b   :  { %v84_v19 = vmul.f32 %v83_v18, %v334_v0  ;;  %v91_v20 = vstv %s90_s12  ;;  %s364_s16 = sld [smem:[#allocation2 + $0x180]]  ;;  %v107_v29 = vstv %s343_s7 }
  0x1c   :  { %v63_v21 = vadd.f32 %v61_v12, %v55_v15  ;;  %v80_v22 = vadd.f32 %v79_v17, %v75_v13  ;;  %v92_v23 = vmul.f32 %v91_v20, %v334_v0  ;;  %v99_v24 = vstv %s98_s14  ;;  %s109_s17 = smul.f32 2.0, %s346_s0  ;;  %s368_s18 = sld [smem:[#allocation2 + $0x181]] }
  0x1d   :  { %v86_v25 = vrot.slane %v84_v19, 1  ;;  %v100_v26 = vmul.f32 %v99_v24, %v334_v0  ;;  %s114_s19 = smul.f32 2.0, %s349_s9  ;;  %s372_s20 = sld [smem:[#allocation2 + $0x182]] }
  0x1e   :  { %v71_v27 = vadd.f32 %v69_v16, %v63_v21  ;;  %v94_v28 = vrot.slane %v92_v23, 2  ;;  %v110_v30 = vstv %s109_s17  ;;  %s122_s21 = smul.f32 2.0, %s353_s11  ;;  %s376_s22 = sld [smem:[#allocation2 + $0x183]] }
  0x1f   :  { %v88_v31 = vadd.f32 %v86_v25, %v80_v22  ;;  %v102_v32 = vrot.slane %v100_v26, 3  ;;  %v111_v33 = vmul.f32 %v110_v30, %v334_v0  ;;  %v115_v34 = vstv %s114_s19  ;;  %s130_s23 = smul.f32 2.0, %s357_s13  ;;  %s380_s1 = sld [smem:[#allocation5 + $0x4]] }
  0x20   :  { %73 = vst.msk [vmem:[#allocation7] sm:$0x1] %vm72_vm0, %v71_v27  ;;  %v116_v35 = vmul.f32 %v115_v34, %v334_v0  ;;  %v123_v36 = vstv %s122_s21  ;;  %s384_s24 = sld [smem:[#allocation2 + $0x200]]  ;;  %v139_v45 = vstv %s361_s15  ;;  %s302_s0 = smov [#allocation7]  }
  0x21   :  { %v96_v37 = vadd.f32 %v94_v28, %v88_v31  ;;  %v112_v38 = vadd.f32 %v111_v33, %v107_v29  ;;  %v124_v39 = vmul.f32 %v123_v36, %v334_v0  ;;  %v131_v40 = vstv %s130_s23  ;;  %s141_s25 = smul.f32 2.0, %s364_s16  ;;  %s388_s26 = sld [smem:[#allocation2 + $0x201]] }
  0x22   :  { %v118_v41 = vrot.slane %v116_v35, 1  ;;  %v132_v42 = vmul.f32 %v131_v40, %v334_v0  ;;  %s146_s2 = smul.f32 2.0, %s368_s18  ;;  %s392_s27 = sld [smem:[#allocation2 + $0x202]] }
  0x23   :  { %v104_v43 = vadd.f32 %v102_v32, %v96_v37  ;;  %v126_v44 = vrot.slane %v124_v39, 2  ;;  %v142_v46 = vstv %s141_s25  ;;  %s154_s28 = smul.f32 2.0, %s372_s20  ;;  %s396_s29 = sld [smem:[#allocation2 + $0x203]] }
  0x24   :  { %v120_v47 = vadd.f32 %v118_v41, %v112_v38  ;;  %v134_v48 = vrot.slane %v132_v42, 3  ;;  %v143_v49 = vmul.f32 %v142_v46, %v334_v0  ;;  %v147_v50 = vstv %s146_s2  ;;  %s162_s30 = smul.f32 2.0, %s376_s22  ;;  %s207_s8 = sshll.u32 %s302_s0, 4  ;;  %s208_s8 = int_to_ptr.vmem [resolvable:$true] %s207_s8 }
  0x25   :  { %105 = vst.msk [vmem:[#allocation7 + $0x1] sm:$0x1] %vm72_vm0, %v104_v43  ;;  %v148_v51 = vmul.f32 %v147_v50, %v334_v0  ;;  %v155_v52 = vstv %s154_s28  ;;  %v171_v61 = vstv %s380_s1  ;;  %s209_s11 = sshll.u32 %s422_s3, 4  ;;  %s210_s11 = int_to_ptr.hbm [resolvable:$true] %s209_s11 }
  0x26   :  { %v128_v53 = vadd.f32 %v126_v44, %v120_v47  ;;  %v144_v54 = vadd.f32 %v143_v49, %v139_v45  ;;  %v156_v55 = vmul.f32 %v155_v52, %v334_v0  ;;  %v163_v56 = vstv %s162_s30  ;;  %s173_s4 = smul.f32 2.0, %s384_s24 }
  0x27   :  { %v150_v57 = vrot.slane %v148_v51, 1  ;;  %v164_v58 = vmul.f32 %v163_v56, %v334_v0  ;;  %s178_s5 = smul.f32 2.0, %s388_s26 }
  0x28   :  { %v136_v59 = vadd.f32 %v134_v48, %v128_v53  ;;  %v158_v60 = vrot.slane %v156_v55, 2  ;;  %v174_v62 = vstv %s173_s4  ;;  %s186_s6 = smul.f32 2.0, %s392_s27 }
  0x29   :  { %v152_v63 = vadd.f32 %v150_v57, %v144_v54  ;;  %v166_v1 = vrot.slane %v164_v58, 3  ;;  %v175_v2 = vmul.f32 %v174_v62, %v334_v0  ;;  %v179_v3 = vstv %s178_s5  ;;  %s194_s7 = smul.f32 2.0, %s396_s29 }
  0x2a   :  { %137 = vst.msk [vmem:[#allocation7 + $0x2] sm:$0x1] %vm72_vm0, %v136_v59  ;;  %v180_v4 = vmul.f32 %v179_v3, %v334_v0  ;;  %v187_v5 = vstv %s186_s6 }
  0x2b   :  { %v160_v6 = vadd.f32 %v158_v60, %v152_v63  ;;  %v176_v7 = vadd.f32 %v175_v2, %v171_v61  ;;  %v188_v8 = vmul.f32 %v187_v5, %v334_v0  ;;  %v195_v9 = vstv %s194_s7 }
  0x2c   :  { %v182_v10 = vrot.slane %v180_v4, 1  ;;  %v196_v11 = vmul.f32 %v195_v9, %v334_v0 }
  0x2d   :  { %v168_v12 = vadd.f32 %v166_v1, %v160_v6  ;;  %v190_v13 = vrot.slane %v188_v8, 2 }
  0x2e   :  { %v184_v14 = vadd.f32 %v182_v10, %v176_v7  ;;  %v198_v15 = vrot.slane %v196_v11, 3 }
  0x2f   :  { %169 = vst.msk [vmem:[#allocation7 + $0x3] sm:$0x1] %vm72_vm0, %v168_v12 }
  0x30   :  { %v192_v16 = vadd.f32 %v190_v13, %v184_v14 }
  0x32   :  { %v200_v17 = vadd.f32 %v198_v15, %v192_v16 }
  0x34   :  { %201 = vst.msk [vmem:[#allocation7 + $0x4] sm:$0x1] %vm72_vm0, %v200_v17 }
  0x35   :  { %212 = dma.vmem_to_hbm [thread:$0]  %s208_s8, 128, %s210_s11, [#allocation3]  }
  0x36   :  { %298 = dma.done.wait [#allocation3], 128  }
  0x37   :  { %299 = vsyncadd [#allocation3], 4294967168 }
  0x38   :  { %217 = vsyncpa [#allocation3], 1 }
  0x39   :  { %218 = vsyncpa [#allocation4], 1 }
  0x3a   :  { %219 = vsyncpa [#allocation6], 1 }

</bundles_post_ra>
